<compile_context>
chip_gen: v6e
topology: v6e:2x2x1
jax: 0.10.0
libtpu: 0.0.40
codegen_flags: <defaults>
</compile_context>

<pallas_src>
import jax
import jax.numpy as jnp
from jax.experimental import pallas as pl
from jax.experimental.pallas import tpu as pltpu


def _vmem(n):
    return [pl.BlockSpec(memory_space=pltpu.MemorySpace.VMEM) for _ in range(n)]


# ---------------- Single fused kernel ----------------------------------------
def fused_new_node_kernel(
        dst_row_ref,   # (1, E)   int32 : destination node of each edge
        dst_col_ref,   # (E, 1)   int32
        src_col_ref,   # (E, 1)   int32 : source node of each edge
        x_ref,         # (V, D)   f32   : initial node features
        e_ref,         # (E, De)  f32   : edge features
        w1i_ref,       # (P, D, D)      : MPN lin1 weight rows acting on x_i
        w1j_ref,       # (P, D, D)      :                     ... on x_j
        w1e_ref,       # (P, De, D)     :                     ... on edge_attr
        b1_ref,        # (P, 1, D)
        w2_ref,        # (P, D, D)
        b2_ref,        # (P, 1, D)
        wih_ref,       # (P, D, 4D)     : LSTM W_ih (acts on input x)
        whh_ref,       # (P, D, 4D)     : LSTM W_hh (acts on hidden a)
        bl_ref,        # (P, 1, 4D)     : b_ih + b_hh
        wro_ref,       # (D, 2G)        : [gm_w | fm_w]
        bro_ref,       # (1, 2G)        : [gm_b | fm_b]
        wfg_ref,       # (G, N)         : f_init weight rows for h_G
        wfx_ref,       # (114, N)       : f_init weight rows for x_v
        bf_ref,        # (1, N)
        xv_ref,        # (1, 114)
        out_ref):      # (1, N)
    V, D = x_ref.shape
    E = e_ref.shape[0]
    P = w1i_ref.shape[0]
    G = wfg_ref.shape[0]
    f32 = jnp.float32

    # Loop-invariant one-hot gather / scatter masks, built in-kernel from the
    # edge indices (iota-compare on the VPU; built exactly once).
    nid_lanes = jax.lax.broadcasted_iota(jnp.int32, (E, V), 1)   # node id along lanes
    nid_subl = jax.lax.broadcasted_iota(jnp.int32, (V, E), 0)    # node id along sublanes
    gath_dst = (nid_lanes == dst_col_ref[...]).astype(f32)       # [E, V]: picks row dst(e)
    gath_src = (nid_lanes == src_col_ref[...]).astype(f32)       # [E, V]: picks row src(e)
    scat_dst = (nid_subl == dst_row_ref[...]).astype(f32)        # [V, E]: scatter-add to dst

    x = x_ref[...]
    e = e_ref[...]
    c = jnp.zeros((V, D), f32)

    for s in range(P):                     # prop_steps: small, static, unrolled
        # ---- MPN message MLP on [x_i | x_j | edge_attr], scatter-add onto dst.
        # Apply per-node weight blocks BEFORE the gather (linear => commutes):
        #   gath_dst @ (x @ W1i) == x[dst] @ W1i    ([V,D]@[D,D] instead of [E,D]@[D,D])
        px_i = jnp.dot(x, w1i_ref[s], preferred_element_type=f32)         # [V, D]
        px_j = jnp.dot(x, w1j_ref[s], preferred_element_type=f32)         # [V, D]
        h = (jnp.dot(gath_dst, px_i, preferred_element_type=f32)
             + jnp.dot(gath_src, px_j, preferred_element_type=f32)
             + jnp.dot(e, w1e_ref[s], preferred_element_type=f32)
             + b1_ref[s])
        h = jnp.maximum(h, 0.0)
        m = jnp.dot(h, w2_ref[s], preferred_element_type=f32) + b2_ref[s]  # [E, D]
        a = jnp.dot(scat_dst, m, preferred_element_type=f32)              # [V, D]

        # ---- LSTMCell(input=x, hidden=a, cell=c); lane-dense [V, 4D] gates.
        gates = (jnp.dot(x, wih_ref[s], preferred_element_type=f32)
                 + jnp.dot(a, whh_ref[s], preferred_element_type=f32)
                 + bl_ref[s])
        sg = jax.nn.sigmoid(gates)         # full-vreg EUP work, slice afterwards
        tg = jnp.tanh(gates)
        i_g = sg[:, 0:D]
        f_g = sg[:, D:2 * D]
        g_g = tg[:, 2 * D:3 * D]
        o_g = sg[:, 3 * D:4 * D]
        c = f_g * c + i_g * g_g
        x = o_g * jnp.tanh(c)

    # ---- readout: h_G = sum_v sigmoid(gm(x)) * fm(x); gm/fm share one matmul.
    ro = jnp.dot(x, wro_ref[...], preferred_element_type=f32) + bro_ref[...]  # [V, 2G]
    gated = jax.nn.sigmoid(ro[:, 0:G]) * ro[:, G:2 * G]
    h_G = jnp.sum(gated, axis=0, keepdims=True)                               # [1, G]

    # ---- f_init on concat([h_G, x_v]) expressed as a split (block) matmul.
    out_ref[...] = (jnp.dot(h_G, wfg_ref[...], preferred_element_type=f32)
                    + jnp.dot(xv_ref[...], wfx_ref[...], preferred_element_type=f32)
                    + bf_ref[...])


# ---------------- Wrapper -----------------------------------------------------
def new_node_forward(params, x, edge_attr, edge_index, x_v, prop_steps):
    V, D = x.shape
    E, De = edge_attr.shape
    G = params["gm_w"].shape[1]
    N = params["f_init_w"].shape[1]

    # Stack per-step parameters along a leading [prop_steps] axis.
    w1 = jnp.stack([params["mpn"][i]["w1"] for i in range(prop_steps)])   # [P, 2D+De, D]
    w1i, w1j, w1e = w1[:, :D, :], w1[:, D:2 * D, :], w1[:, 2 * D:, :]
    b1 = jnp.stack([params["mpn"][i]["b1"] for i in range(prop_steps)])   # [P, 1, D]
    w2 = jnp.stack([params["mpn"][i]["w2"] for i in range(prop_steps)])   # [P, D, D]
    b2 = jnp.stack([params["mpn"][i]["b2"] for i in range(prop_steps)])   # [P, 1, D]
    wih = jnp.stack([params["lstm"][i]["wih"] for i in range(prop_steps)])  # [P, D, 4D]
    whh = jnp.stack([params["lstm"][i]["whh"] for i in range(prop_steps)])  # [P, D, 4D]
    bl = jnp.stack([params["lstm"][i]["b"] for i in range(prop_steps)])   # [P, 1, 4D]

    wro = jnp.concatenate([params["gm_w"], params["fm_w"]], axis=1)       # [D, 2G]
    bro = jnp.concatenate([params["gm_b"], params["fm_b"]], axis=1)       # [1, 2G]
    wfg = params["f_init_w"][:G]                                          # [G, N]
    wfx = params["f_init_w"][G:]                                          # [114, N]
    bf = params["f_init_b"]                                               # [1, N]

    dst = edge_index[1].astype(jnp.int32)
    src = edge_index[0].astype(jnp.int32)
    dst_row = dst[None, :]                                                # (1, E)
    dst_col = dst[:, None]                                                # (E, 1)
    src_col = src[:, None]                                                # (E, 1)
    xv = x_v[None, :]                                                     # (1, 114)

    out = pl.pallas_call(
        fused_new_node_kernel,
        out_shape=jax.ShapeDtypeStruct((1, N), x.dtype),
        in_specs=_vmem(20),
        out_specs=pl.BlockSpec(memory_space=pltpu.MemorySpace.VMEM),
    )(dst_row, dst_col, src_col, x, edge_attr,
      w1i, w1j, w1e, b1, w2, b2, wih, whh, bl, wro, bro, wfg, wfx, bf, xv)
    return out[0]                                                         # [N]


# ---------------- Pure-JAX reference (for correctness check) -----------------
def reference_forward(params, x, edge_attr, edge_index, x_v, prop_steps):
    V, D = x.shape
    c = jnp.zeros_like(x)
    for i in range(prop_steps):
        p = params["mpn"][i]
        src, dst = edge_index[0], edge_index[1]
        msg_in = jnp.concatenate([x[dst], x[src], edge_attr], axis=1)
        h = jnp.maximum(msg_in @ p["w1"] + p["b1"], 0.0)
        m = h @ p["w2"] + p["b2"]
        a = jnp.zeros((V, D), x.dtype).at[dst].add(m)
        q = params["lstm"][i]
        gates = x @ q["wih"] + a @ q["whh"] + q["b"]
        i_g = jax.nn.sigmoid(gates[:, 0:D])
        f_g = jax.nn.sigmoid(gates[:, D:2 * D])
        g_g = jnp.tanh(gates[:, 2 * D:3 * D])
        o_g = jax.nn.sigmoid(gates[:, 3 * D:4 * D])
        c = f_g * c + i_g * g_g
        x = o_g * jnp.tanh(c)
    g = jax.nn.sigmoid(x @ params["gm_w"] + params["gm_b"])
    hv = x @ params["fm_w"] + params["fm_b"]
    h_G = jnp.sum(g * hv, axis=0)
    feat = jnp.concatenate([h_G, x_v], axis=0)[None, :]
    return (feat @ params["f_init_w"] + params["f_init_b"])[0]


# ---------------- Deterministic parameter init --------------------------------
def init_linear(key, fan_in, fan_out):
    k1, k2 = jax.random.split(key)
    bound = 1.0 / float(fan_in) ** 0.5
    w = jax.random.uniform(k1, (fan_in, fan_out), jnp.float32, -bound, bound)
    b = jax.random.uniform(k2, (1, fan_out), jnp.float32, -bound, bound)
    return w, b


def init_params(key, node_dim, edge_dim, graph_dim, prop_steps):
    params = {"mpn": [], "lstm": []}
    keys = jax.random.split(key, 4 * prop_steps + 3)
    ki = 0
    for _ in range(prop_steps):
        w1, b1 = init_linear(keys[ki], 2 * node_dim + edge_dim, node_dim); ki += 1
        w2, b2 = init_linear(keys[ki], node_dim, node_dim); ki += 1
        params["mpn"].append({"w1": w1, "b1": b1, "w2": w2, "b2": b2})
        wih, bih = init_linear(keys[ki], node_dim, 4 * node_dim); ki += 1
        whh, bhh = init_linear(keys[ki], node_dim, 4 * node_dim); ki += 1
        params["lstm"].append({"wih": wih, "whh": whh, "b": bih + bhh})
    params["gm_w"], params["gm_b"] = init_linear(keys[ki], node_dim, graph_dim); ki += 1
    params["fm_w"], params["fm_b"] = init_linear(keys[ki], node_dim, graph_dim); ki += 1
    params["f_init_w"], params["f_init_b"] = init_linear(
        keys[ki], graph_dim + 114, node_dim); ki += 1
    return params


if __name__ == "__main__":
    NODE_DIM, EDGE_DIM, GRAPH_DIM, PROP_STEPS = 32, 16, 48, 2
    V, E = 8, 16

    key = jax.random.PRNGKey(0)
    k_par, k_x, k_e, k_src, k_dst, k_xv = jax.random.split(key, 6)

    params = init_params(k_par, NODE_DIM, EDGE_DIM, GRAPH_DIM, PROP_STEPS)
    x = jax.random.normal(k_x, (V, NODE_DIM), jnp.float32)
    edge_attr = jax.random.normal(k_e, (E, EDGE_DIM), jnp.float32)
    edge_index = jnp.stack([jax.random.randint(k_src, (E,), 0, V),
                            jax.random.randint(k_dst, (E,), 0, V)], axis=0)
    x_v = jax.random.normal(k_xv, (114,), jnp.float32)

    out = new_node_forward(params, x, edge_attr, edge_index, x_v, PROP_STEPS)
    out = jax.block_until_ready(out)

    ref = reference_forward(params, x, edge_attr, edge_index, x_v, PROP_STEPS)
    assert out.shape == (NODE_DIM,)
    assert jnp.allclose(out, ref, rtol=1e-3, atol=1e-3), (out, ref)
    print("KERNEL_OK")
</pallas_src>

<mosaic_0001>
module attributes {stable_mosaic.version = 11 : i64} {
  func.func @fused_new_node_kernel(%arg0: memref<1x16xi32, #tpu.memory_space<vmem>>, %arg1: memref<16x1xi32, #tpu.memory_space<vmem>>, %arg2: memref<16x1xi32, #tpu.memory_space<vmem>>, %arg3: memref<8x32xf32, #tpu.memory_space<vmem>>, %arg4: memref<16x16xf32, #tpu.memory_space<vmem>>, %arg5: memref<2x32x32xf32, #tpu.memory_space<vmem>>, %arg6: memref<2x32x32xf32, #tpu.memory_space<vmem>>, %arg7: memref<2x16x32xf32, #tpu.memory_space<vmem>>, %arg8: memref<2x1x32xf32, #tpu.memory_space<vmem>>, %arg9: memref<2x32x32xf32, #tpu.memory_space<vmem>>, %arg10: memref<2x1x32xf32, #tpu.memory_space<vmem>>, %arg11: memref<2x32x128xf32, #tpu.memory_space<vmem>>, %arg12: memref<2x32x128xf32, #tpu.memory_space<vmem>>, %arg13: memref<2x1x128xf32, #tpu.memory_space<vmem>>, %arg14: memref<32x96xf32, #tpu.memory_space<vmem>>, %arg15: memref<1x96xf32, #tpu.memory_space<vmem>>, %arg16: memref<48x32xf32, #tpu.memory_space<vmem>>, %arg17: memref<114x32xf32, #tpu.memory_space<vmem>>, %arg18: memref<1x32xf32, #tpu.memory_space<vmem>>, %arg19: memref<1x114xf32, #tpu.memory_space<vmem>>, %arg20: memref<1x32xf32, #tpu.memory_space<vmem>>) attributes {dimension_semantics = [], scalar_prefetch = 0 : i64, scratch_operands = 0 : i64, tpu.core_type = #tpu.core_type<tc>} {
    %0 = tpu.iota {dimensions = array<i32: 1>} : vector<16x8xi32>
    %1 = tpu.iota {dimensions = array<i32: 0>} : vector<8x16xi32>
    %c0 = arith.constant 0 : index
    %c0_0 = arith.constant 0 : index
    %2 = vector.load %arg1[%c0, %c0_0] : memref<16x1xi32, #tpu.memory_space<vmem>>, vector<16x1xi32>
    %3 = vector.broadcast %2 : vector<16x1xi32> to vector<16x8xi32>
    %4 = arith.cmpi eq, %0, %3 : vector<16x8xi32>
    %5 = arith.extui %4 : vector<16x8xi1> to vector<16x8xi32>
    %6 = arith.sitofp %5 : vector<16x8xi32> to vector<16x8xf32>
    %c0_1 = arith.constant 0 : index
    %c0_2 = arith.constant 0 : index
    %7 = vector.load %arg2[%c0_1, %c0_2] : memref<16x1xi32, #tpu.memory_space<vmem>>, vector<16x1xi32>
    %8 = vector.broadcast %7 : vector<16x1xi32> to vector<16x8xi32>
    %9 = arith.cmpi eq, %0, %8 : vector<16x8xi32>
    %10 = arith.extui %9 : vector<16x8xi1> to vector<16x8xi32>
    %11 = arith.sitofp %10 : vector<16x8xi32> to vector<16x8xf32>
    %c0_3 = arith.constant 0 : index
    %c0_4 = arith.constant 0 : index
    %12 = vector.load %arg0[%c0_3, %c0_4] : memref<1x16xi32, #tpu.memory_space<vmem>>, vector<1x16xi32>
    %13 = vector.broadcast %12 : vector<1x16xi32> to vector<8x16xi32>
    %14 = arith.cmpi eq, %1, %13 : vector<8x16xi32>
    %15 = arith.extui %14 : vector<8x16xi1> to vector<8x16xi32>
    %16 = arith.sitofp %15 : vector<8x16xi32> to vector<8x16xf32>
    %c0_5 = arith.constant 0 : index
    %c0_6 = arith.constant 0 : index
    %17 = vector.load %arg3[%c0_5, %c0_6] : memref<8x32xf32, #tpu.memory_space<vmem>>, vector<8x32xf32>
    %c0_7 = arith.constant 0 : index
    %c0_8 = arith.constant 0 : index
    %18 = vector.load %arg4[%c0_7, %c0_8] : memref<16x16xf32, #tpu.memory_space<vmem>>, vector<16x16xf32>
    %cst = arith.constant 0.000000e+00 : f32
    %19 = vector.broadcast %cst : f32 to vector<8x32xf32>
    %c0_9 = arith.constant 0 : index
    %c0_10 = arith.constant 0 : index
    %c0_11 = arith.constant 0 : index
    %20 = vector.load %arg5[%c0_9, %c0_10, %c0_11] : memref<2x32x32xf32, #tpu.memory_space<vmem>>, vector<1x32x32xf32>
    %21 = vector.shape_cast %20 : vector<1x32x32xf32> to vector<32x32xf32>
    %cst_12 = arith.constant dense<0.000000e+00> : vector<8x32xf32>
    %22 = tpu.matmul %17, %21, %cst_12 {dimension_numbers = #tpu.dot_dimension_numbers<[1], [0], [0], [1], [0, 0, 1, 1], [], []>} : vector<8x32xf32>, vector<32x32xf32>, vector<8x32xf32> -> vector<8x32xf32>
    %c0_13 = arith.constant 0 : index
    %c0_14 = arith.constant 0 : index
    %c0_15 = arith.constant 0 : index
    %23 = vector.load %arg6[%c0_13, %c0_14, %c0_15] : memref<2x32x32xf32, #tpu.memory_space<vmem>>, vector<1x32x32xf32>
    %24 = vector.shape_cast %23 : vector<1x32x32xf32> to vector<32x32xf32>
    %cst_16 = arith.constant dense<0.000000e+00> : vector<8x32xf32>
    %25 = tpu.matmul %17, %24, %cst_16 {dimension_numbers = #tpu.dot_dimension_numbers<[1], [0], [0], [1], [0, 0, 1, 1], [], []>} : vector<8x32xf32>, vector<32x32xf32>, vector<8x32xf32> -> vector<8x32xf32>
    %cst_17 = arith.constant dense<0.000000e+00> : vector<16x32xf32>
    %26 = tpu.matmul %6, %22, %cst_17 {dimension_numbers = #tpu.dot_dimension_numbers<[1], [0], [0], [1], [0, 0, 1, 1], [], []>} : vector<16x8xf32>, vector<8x32xf32>, vector<16x32xf32> -> vector<16x32xf32>
    %cst_18 = arith.constant dense<0.000000e+00> : vector<16x32xf32>
    %27 = tpu.matmul %11, %25, %cst_18 {dimension_numbers = #tpu.dot_dimension_numbers<[1], [0], [0], [1], [0, 0, 1, 1], [], []>} : vector<16x8xf32>, vector<8x32xf32>, vector<16x32xf32> -> vector<16x32xf32>
    %28 = arith.addf %26, %27 : vector<16x32xf32>
    %c0_19 = arith.constant 0 : index
    %c0_20 = arith.constant 0 : index
    %c0_21 = arith.constant 0 : index
    %29 = vector.load %arg7[%c0_19, %c0_20, %c0_21] : memref<2x16x32xf32, #tpu.memory_space<vmem>>, vector<1x16x32xf32>
    %30 = vector.shape_cast %29 : vector<1x16x32xf32> to vector<16x32xf32>
    %cst_22 = arith.constant dense<0.000000e+00> : vector<16x32xf32>
    %31 = tpu.matmul %18, %30, %cst_22 {dimension_numbers = #tpu.dot_dimension_numbers<[1], [0], [0], [1], [0, 0, 1, 1], [], []>} : vector<16x16xf32>, vector<16x32xf32>, vector<16x32xf32> -> vector<16x32xf32>
    %32 = arith.addf %28, %31 : vector<16x32xf32>
    %c0_23 = arith.constant 0 : index
    %c0_24 = arith.constant 0 : index
    %c0_25 = arith.constant 0 : index
    %33 = vector.load %arg8[%c0_23, %c0_24, %c0_25] : memref<2x1x32xf32, #tpu.memory_space<vmem>>, vector<1x1x32xf32>
    %34 = vector.shape_cast %33 : vector<1x1x32xf32> to vector<1x32xf32>
    %35 = vector.broadcast %34 : vector<1x32xf32> to vector<16x32xf32>
    %36 = arith.addf %32, %35 : vector<16x32xf32>
    %cst_26 = arith.constant 0.000000e+00 : f32
    %37 = vector.broadcast %cst_26 : f32 to vector<16x32xf32>
    %38 = arith.maximumf %36, %37 : vector<16x32xf32>
    %c0_27 = arith.constant 0 : index
    %c0_28 = arith.constant 0 : index
    %c0_29 = arith.constant 0 : index
    %39 = vector.load %arg9[%c0_27, %c0_28, %c0_29] : memref<2x32x32xf32, #tpu.memory_space<vmem>>, vector<1x32x32xf32>
    %40 = vector.shape_cast %39 : vector<1x32x32xf32> to vector<32x32xf32>
    %cst_30 = arith.constant dense<0.000000e+00> : vector<16x32xf32>
    %41 = tpu.matmul %38, %40, %cst_30 {dimension_numbers = #tpu.dot_dimension_numbers<[1], [0], [0], [1], [0, 0, 1, 1], [], []>} : vector<16x32xf32>, vector<32x32xf32>, vector<16x32xf32> -> vector<16x32xf32>
    %c0_31 = arith.constant 0 : index
    %c0_32 = arith.constant 0 : index
    %c0_33 = arith.constant 0 : index
    %42 = vector.load %arg10[%c0_31, %c0_32, %c0_33] : memref<2x1x32xf32, #tpu.memory_space<vmem>>, vector<1x1x32xf32>
    %43 = vector.shape_cast %42 : vector<1x1x32xf32> to vector<1x32xf32>
    %44 = vector.broadcast %43 : vector<1x32xf32> to vector<16x32xf32>
    %45 = arith.addf %41, %44 : vector<16x32xf32>
    %cst_34 = arith.constant dense<0.000000e+00> : vector<8x32xf32>
    %46 = tpu.matmul %16, %45, %cst_34 {dimension_numbers = #tpu.dot_dimension_numbers<[1], [0], [0], [1], [0, 0, 1, 1], [], []>} : vector<8x16xf32>, vector<16x32xf32>, vector<8x32xf32> -> vector<8x32xf32>
    %c0_35 = arith.constant 0 : index
    %c0_36 = arith.constant 0 : index
    %c0_37 = arith.constant 0 : index
    %47 = vector.load %arg11[%c0_35, %c0_36, %c0_37] : memref<2x32x128xf32, #tpu.memory_space<vmem>>, vector<1x32x128xf32>
    %48 = vector.shape_cast %47 : vector<1x32x128xf32> to vector<32x128xf32>
    %cst_38 = arith.constant dense<0.000000e+00> : vector<8x128xf32>
    %49 = tpu.matmul %17, %48, %cst_38 {dimension_numbers = #tpu.dot_dimension_numbers<[1], [0], [0], [1], [0, 0, 1, 1], [], []>} : vector<8x32xf32>, vector<32x128xf32>, vector<8x128xf32> -> vector<8x128xf32>
    %c0_39 = arith.constant 0 : index
    %c0_40 = arith.constant 0 : index
    %c0_41 = arith.constant 0 : index
    %50 = vector.load %arg12[%c0_39, %c0_40, %c0_41] : memref<2x32x128xf32, #tpu.memory_space<vmem>>, vector<1x32x128xf32>
    %51 = vector.shape_cast %50 : vector<1x32x128xf32> to vector<32x128xf32>
    %cst_42 = arith.constant dense<0.000000e+00> : vector<8x128xf32>
    %52 = tpu.matmul %46, %51, %cst_42 {dimension_numbers = #tpu.dot_dimension_numbers<[1], [0], [0], [1], [0, 0, 1, 1], [], []>} : vector<8x32xf32>, vector<32x128xf32>, vector<8x128xf32> -> vector<8x128xf32>
    %53 = arith.addf %49, %52 : vector<8x128xf32>
    %c0_43 = arith.constant 0 : index
    %c0_44 = arith.constant 0 : index
    %c0_45 = arith.constant 0 : index
    %54 = vector.load %arg13[%c0_43, %c0_44, %c0_45] : memref<2x1x128xf32, #tpu.memory_space<vmem>>, vector<1x1x128xf32>
    %55 = vector.shape_cast %54 : vector<1x1x128xf32> to vector<1x128xf32>
    %56 = vector.broadcast %55 : vector<1x128xf32> to vector<8x128xf32>
    %57 = arith.addf %53, %56 : vector<8x128xf32>
    %58 = arith.negf %57 : vector<8x128xf32>
    %59 = math.exp %58 : vector<8x128xf32>
    %cst_46 = arith.constant 1.000000e+00 : f32
    %60 = vector.broadcast %cst_46 : f32 to vector<8x128xf32>
    %61 = arith.addf %60, %59 : vector<8x128xf32>
    %62 = arith.divf %60, %61 : vector<8x128xf32>
    %63 = math.tanh %57 : vector<8x128xf32>
    %64 = vector.extract_strided_slice %62 {offsets = [0, 0], sizes = [8, 32], strides = [1, 1]} : vector<8x128xf32> to vector<8x32xf32>
    %65 = vector.extract_strided_slice %62 {offsets = [0, 32], sizes = [8, 32], strides = [1, 1]} : vector<8x128xf32> to vector<8x32xf32>
    %66 = vector.extract_strided_slice %63 {offsets = [0, 64], sizes = [8, 32], strides = [1, 1]} : vector<8x128xf32> to vector<8x32xf32>
    %67 = vector.extract_strided_slice %62 {offsets = [0, 96], sizes = [8, 32], strides = [1, 1]} : vector<8x128xf32> to vector<8x32xf32>
    %68 = arith.mulf %65, %19 : vector<8x32xf32>
    %69 = arith.mulf %64, %66 : vector<8x32xf32>
    %70 = arith.addf %68, %69 : vector<8x32xf32>
    %71 = math.tanh %70 : vector<8x32xf32>
    %72 = arith.mulf %67, %71 : vector<8x32xf32>
    %c1 = arith.constant 1 : index
    %c0_47 = arith.constant 0 : index
    %c0_48 = arith.constant 0 : index
    %73 = vector.load %arg5[%c1, %c0_47, %c0_48] : memref<2x32x32xf32, #tpu.memory_space<vmem>>, vector<1x32x32xf32>
    %74 = vector.shape_cast %73 : vector<1x32x32xf32> to vector<32x32xf32>
    %cst_49 = arith.constant dense<0.000000e+00> : vector<8x32xf32>
    %75 = tpu.matmul %72, %74, %cst_49 {dimension_numbers = #tpu.dot_dimension_numbers<[1], [0], [0], [1], [0, 0, 1, 1], [], []>} : vector<8x32xf32>, vector<32x32xf32>, vector<8x32xf32> -> vector<8x32xf32>
    %c1_50 = arith.constant 1 : index
    %c0_51 = arith.constant 0 : index
    %c0_52 = arith.constant 0 : index
    %76 = vector.load %arg6[%c1_50, %c0_51, %c0_52] : memref<2x32x32xf32, #tpu.memory_space<vmem>>, vector<1x32x32xf32>
    %77 = vector.shape_cast %76 : vector<1x32x32xf32> to vector<32x32xf32>
    %cst_53 = arith.constant dense<0.000000e+00> : vector<8x32xf32>
    %78 = tpu.matmul %72, %77, %cst_53 {dimension_numbers = #tpu.dot_dimension_numbers<[1], [0], [0], [1], [0, 0, 1, 1], [], []>} : vector<8x32xf32>, vector<32x32xf32>, vector<8x32xf32> -> vector<8x32xf32>
    %cst_54 = arith.constant dense<0.000000e+00> : vector<16x32xf32>
    %79 = tpu.matmul %6, %75, %cst_54 {dimension_numbers = #tpu.dot_dimension_numbers<[1], [0], [0], [1], [0, 0, 1, 1], [], []>} : vector<16x8xf32>, vector<8x32xf32>, vector<16x32xf32> -> vector<16x32xf32>
    %cst_55 = arith.constant dense<0.000000e+00> : vector<16x32xf32>
    %80 = tpu.matmul %11, %78, %cst_55 {dimension_numbers = #tpu.dot_dimension_numbers<[1], [0], [0], [1], [0, 0, 1, 1], [], []>} : vector<16x8xf32>, vector<8x32xf32>, vector<16x32xf32> -> vector<16x32xf32>
    %81 = arith.addf %79, %80 : vector<16x32xf32>
    %c1_56 = arith.constant 1 : index
    %c0_57 = arith.constant 0 : index
    %c0_58 = arith.constant 0 : index
    %82 = vector.load %arg7[%c1_56, %c0_57, %c0_58] : memref<2x16x32xf32, #tpu.memory_space<vmem>>, vector<1x16x32xf32>
    %83 = vector.shape_cast %82 : vector<1x16x32xf32> to vector<16x32xf32>
    %cst_59 = arith.constant dense<0.000000e+00> : vector<16x32xf32>
    %84 = tpu.matmul %18, %83, %cst_59 {dimension_numbers = #tpu.dot_dimension_numbers<[1], [0], [0], [1], [0, 0, 1, 1], [], []>} : vector<16x16xf32>, vector<16x32xf32>, vector<16x32xf32> -> vector<16x32xf32>
    %85 = arith.addf %81, %84 : vector<16x32xf32>
    %c1_60 = arith.constant 1 : index
    %c0_61 = arith.constant 0 : index
    %c0_62 = arith.constant 0 : index
    %86 = vector.load %arg8[%c1_60, %c0_61, %c0_62] : memref<2x1x32xf32, #tpu.memory_space<vmem>>, vector<1x1x32xf32>
    %87 = vector.shape_cast %86 : vector<1x1x32xf32> to vector<1x32xf32>
    %88 = vector.broadcast %87 : vector<1x32xf32> to vector<16x32xf32>
    %89 = arith.addf %85, %88 : vector<16x32xf32>
    %cst_63 = arith.constant 0.000000e+00 : f32
    %90 = vector.broadcast %cst_63 : f32 to vector<16x32xf32>
    %91 = arith.maximumf %89, %90 : vector<16x32xf32>
    %c1_64 = arith.constant 1 : index
    %c0_65 = arith.constant 0 : index
    %c0_66 = arith.constant 0 : index
    %92 = vector.load %arg9[%c1_64, %c0_65, %c0_66] : memref<2x32x32xf32, #tpu.memory_space<vmem>>, vector<1x32x32xf32>
    %93 = vector.shape_cast %92 : vector<1x32x32xf32> to vector<32x32xf32>
    %cst_67 = arith.constant dense<0.000000e+00> : vector<16x32xf32>
    %94 = tpu.matmul %91, %93, %cst_67 {dimension_numbers = #tpu.dot_dimension_numbers<[1], [0], [0], [1], [0, 0, 1, 1], [], []>} : vector<16x32xf32>, vector<32x32xf32>, vector<16x32xf32> -> vector<16x32xf32>
    %c1_68 = arith.constant 1 : index
    %c0_69 = arith.constant 0 : index
    %c0_70 = arith.constant 0 : index
    %95 = vector.load %arg10[%c1_68, %c0_69, %c0_70] : memref<2x1x32xf32, #tpu.memory_space<vmem>>, vector<1x1x32xf32>
    %96 = vector.shape_cast %95 : vector<1x1x32xf32> to vector<1x32xf32>
    %97 = vector.broadcast %96 : vector<1x32xf32> to vector<16x32xf32>
    %98 = arith.addf %94, %97 : vector<16x32xf32>
    %cst_71 = arith.constant dense<0.000000e+00> : vector<8x32xf32>
    %99 = tpu.matmul %16, %98, %cst_71 {dimension_numbers = #tpu.dot_dimension_numbers<[1], [0], [0], [1], [0, 0, 1, 1], [], []>} : vector<8x16xf32>, vector<16x32xf32>, vector<8x32xf32> -> vector<8x32xf32>
    %c1_72 = arith.constant 1 : index
    %c0_73 = arith.constant 0 : index
    %c0_74 = arith.constant 0 : index
    %100 = vector.load %arg11[%c1_72, %c0_73, %c0_74] : memref<2x32x128xf32, #tpu.memory_space<vmem>>, vector<1x32x128xf32>
    %101 = vector.shape_cast %100 : vector<1x32x128xf32> to vector<32x128xf32>
    %cst_75 = arith.constant dense<0.000000e+00> : vector<8x128xf32>
    %102 = tpu.matmul %72, %101, %cst_75 {dimension_numbers = #tpu.dot_dimension_numbers<[1], [0], [0], [1], [0, 0, 1, 1], [], []>} : vector<8x32xf32>, vector<32x128xf32>, vector<8x128xf32> -> vector<8x128xf32>
    %c1_76 = arith.constant 1 : index
    %c0_77 = arith.constant 0 : index
    %c0_78 = arith.constant 0 : index
    %103 = vector.load %arg12[%c1_76, %c0_77, %c0_78] : memref<2x32x128xf32, #tpu.memory_space<vmem>>, vector<1x32x128xf32>
    %104 = vector.shape_cast %103 : vector<1x32x128xf32> to vector<32x128xf32>
    %cst_79 = arith.constant dense<0.000000e+00> : vector<8x128xf32>
    %105 = tpu.matmul %99, %104, %cst_79 {dimension_numbers = #tpu.dot_dimension_numbers<[1], [0], [0], [1], [0, 0, 1, 1], [], []>} : vector<8x32xf32>, vector<32x128xf32>, vector<8x128xf32> -> vector<8x128xf32>
    %106 = arith.addf %102, %105 : vector<8x128xf32>
    %c1_80 = arith.constant 1 : index
    %c0_81 = arith.constant 0 : index
    %c0_82 = arith.constant 0 : index
    %107 = vector.load %arg13[%c1_80, %c0_81, %c0_82] : memref<2x1x128xf32, #tpu.memory_space<vmem>>, vector<1x1x128xf32>
    %108 = vector.shape_cast %107 : vector<1x1x128xf32> to vector<1x128xf32>
    %109 = vector.broadcast %108 : vector<1x128xf32> to vector<8x128xf32>
    %110 = arith.addf %106, %109 : vector<8x128xf32>
    %111 = arith.negf %110 : vector<8x128xf32>
    %112 = math.exp %111 : vector<8x128xf32>
    %cst_83 = arith.constant 1.000000e+00 : f32
    %113 = vector.broadcast %cst_83 : f32 to vector<8x128xf32>
    %114 = arith.addf %113, %112 : vector<8x128xf32>
    %115 = arith.divf %113, %114 : vector<8x128xf32>
    %116 = math.tanh %110 : vector<8x128xf32>
    %117 = vector.extract_strided_slice %115 {offsets = [0, 0], sizes = [8, 32], strides = [1, 1]} : vector<8x128xf32> to vector<8x32xf32>
    %118 = vector.extract_strided_slice %115 {offsets = [0, 32], sizes = [8, 32], strides = [1, 1]} : vector<8x128xf32> to vector<8x32xf32>
    %119 = vector.extract_strided_slice %116 {offsets = [0, 64], sizes = [8, 32], strides = [1, 1]} : vector<8x128xf32> to vector<8x32xf32>
    %120 = vector.extract_strided_slice %115 {offsets = [0, 96], sizes = [8, 32], strides = [1, 1]} : vector<8x128xf32> to vector<8x32xf32>
    %121 = arith.mulf %118, %70 : vector<8x32xf32>
    %122 = arith.mulf %117, %119 : vector<8x32xf32>
    %123 = arith.addf %121, %122 : vector<8x32xf32>
    %124 = math.tanh %123 : vector<8x32xf32>
    %125 = arith.mulf %120, %124 : vector<8x32xf32>
    %c0_84 = arith.constant 0 : index
    %c0_85 = arith.constant 0 : index
    %126 = vector.load %arg14[%c0_84, %c0_85] : memref<32x96xf32, #tpu.memory_space<vmem>>, vector<32x96xf32>
    %cst_86 = arith.constant dense<0.000000e+00> : vector<8x96xf32>
    %127 = tpu.matmul %125, %126, %cst_86 {dimension_numbers = #tpu.dot_dimension_numbers<[1], [0], [0], [1], [0, 0, 1, 1], [], []>} : vector<8x32xf32>, vector<32x96xf32>, vector<8x96xf32> -> vector<8x96xf32>
    %c0_87 = arith.constant 0 : index
    %c0_88 = arith.constant 0 : index
    %128 = vector.load %arg15[%c0_87, %c0_88] : memref<1x96xf32, #tpu.memory_space<vmem>>, vector<1x96xf32>
    %129 = vector.broadcast %128 : vector<1x96xf32> to vector<8x96xf32>
    %130 = arith.addf %127, %129 : vector<8x96xf32>
    %131 = vector.extract_strided_slice %130 {offsets = [0, 0], sizes = [8, 48], strides = [1, 1]} : vector<8x96xf32> to vector<8x48xf32>
    %132 = arith.negf %131 : vector<8x48xf32>
    %133 = math.exp %132 : vector<8x48xf32>
    %cst_89 = arith.constant 1.000000e+00 : f32
    %134 = vector.broadcast %cst_89 : f32 to vector<8x48xf32>
    %135 = arith.addf %134, %133 : vector<8x48xf32>
    %136 = arith.divf %134, %135 : vector<8x48xf32>
    %137 = vector.extract_strided_slice %130 {offsets = [0, 48], sizes = [8, 48], strides = [1, 1]} : vector<8x96xf32> to vector<8x48xf32>
    %138 = arith.mulf %136, %137 : vector<8x48xf32>
    %cst_90 = arith.constant dense<0.000000e+00> : vector<48xf32>
    %139 = vector.multi_reduction <add>, %138, %cst_90 [0] : vector<8x48xf32> to vector<48xf32>
    %140 = vector.shape_cast %139 : vector<48xf32> to vector<1x48xf32>
    %c0_91 = arith.constant 0 : index
    %c0_92 = arith.constant 0 : index
    %141 = vector.load %arg16[%c0_91, %c0_92] : memref<48x32xf32, #tpu.memory_space<vmem>>, vector<48x32xf32>
    %cst_93 = arith.constant dense<0.000000e+00> : vector<1x32xf32>
    %142 = tpu.matmul %140, %141, %cst_93 {dimension_numbers = #tpu.dot_dimension_numbers<[1], [0], [0], [1], [0, 0, 1, 1], [], []>} : vector<1x48xf32>, vector<48x32xf32>, vector<1x32xf32> -> vector<1x32xf32>
    %c0_94 = arith.constant 0 : index
    %c0_95 = arith.constant 0 : index
    %143 = vector.load %arg19[%c0_94, %c0_95] : memref<1x114xf32, #tpu.memory_space<vmem>>, vector<1x114xf32>
    %c0_96 = arith.constant 0 : index
    %c0_97 = arith.constant 0 : index
    %144 = vector.load %arg17[%c0_96, %c0_97] : memref<114x32xf32, #tpu.memory_space<vmem>>, vector<114x32xf32>
    %cst_98 = arith.constant dense<0.000000e+00> : vector<1x32xf32>
    %145 = tpu.matmul %143, %144, %cst_98 {dimension_numbers = #tpu.dot_dimension_numbers<[1], [0], [0], [1], [0, 0, 1, 1], [], []>} : vector<1x114xf32>, vector<114x32xf32>, vector<1x32xf32> -> vector<1x32xf32>
    %146 = arith.addf %142, %145 : vector<1x32xf32>
    %c0_99 = arith.constant 0 : index
    %c0_100 = arith.constant 0 : index
    %147 = vector.load %arg18[%c0_99, %c0_100] : memref<1x32xf32, #tpu.memory_space<vmem>>, vector<1x32xf32>
    %148 = arith.addf %146, %147 : vector<1x32xf32>
    %c0_101 = arith.constant 0 : index
    %c0_102 = arith.constant 0 : index
    %149 = vector.load %arg20[%c0_101, %c0_102] : memref<1x32xf32, #tpu.memory_space<vmem>>, vector<1x32xf32>
    tpu.vector_store %arg20[%c0_101, %c0_102], %148 {strides = array<i32>} : memref<1x32xf32, #tpu.memory_space<vmem>>, vector<1x32xf32>,
    return
  }
}

</mosaic_0001>

<bundles_post_ra>
// kernel: tpu_custom_call.1
= control target key start
LH: loop header
LB: loop body
LE: loop exit
PB: predicated region body
PF: predicated region fallthrough
CT: control target
= control target key end

     0   :  { %s3091_s0 = inlined_call_operand.vmem [shape: s32[1,16], index: 0, kind: input, shape index: {}]   ;;  %s3092_s1 = inlined_call_operand.vmem [shape: s32[16,1], index: 1, kind: input, shape index: {}]   ;;  %s3093_s2 = inlined_call_operand.vmem [shape: s32[16,1], index: 2, kind: input, shape index: {}]   ;;  %s3094_s3 = inlined_call_operand.hbm [shape: f32[8,32], index: 3, kind: input, shape index: {}]   ;;  %s3095_s4 = inlined_call_operand.hbm [shape: f32[16,16], index: 4, kind: input, shape index: {}]   ;;  %s3096_s5 = inlined_call_operand.vmem [shape: f32[2,32,32], index: 5, kind: input, shape index: {}]   ;;  %s3097_s6 = inlined_call_operand.vmem [shape: f32[2,32,32], index: 6, kind: input, shape index: {}]   ;;  %s3098_s7 = inlined_call_operand.hbm [shape: f32[2,16,32], index: 7, kind: input, shape index: {}]   ;;  %s3099_s8 = inlined_call_operand.vmem [shape: f32[2,1,32], index: 8, kind: input, shape index: {}]   ;;  %s3100_s9 = inlined_call_operand.vmem [shape: f32[2,32,32], index: 9, kind: input, shape index: {}]   ;;  %s3101_s10 = inlined_call_operand.vmem [shape: f32[2,1,32], index: 10, kind: input, shape index: {}]   ;;  %s3102_s11 = inlined_call_operand.vmem [shape: f32[2,32,128], index: 11, kind: input, shape index: {}]   ;;  %s3103_s12 = inlined_call_operand.hbm [shape: f32[2,32,128], index: 12, kind: input, shape index: {}]   ;;  %s3104_s13 = inlined_call_operand.vmem [shape: f32[2,1,128], index: 13, kind: input, shape index: {}]   ;;  %s3105_s14 = inlined_call_operand.hbm [shape: f32[32,96], index: 14, kind: input, shape index: {}]   ;;  %s3106_s15 = inlined_call_operand.hbm [shape: f32[1,96], index: 15, kind: input, shape index: {}]   ;;  %s3107_s16 = inlined_call_operand.vmem [shape: f32[48,32], index: 16, kind: input, shape index: {}]   ;;  %s3108_s17 = inlined_call_operand.vmem [shape: f32[114,32], index: 17, kind: input, shape index: {}]   ;;  %s3109_s18 = inlined_call_operand.vmem [shape: f32[1,32], index: 18, kind: input, shape index: {}]   ;;  %s3110_s19 = inlined_call_operand.vmem [shape: f32[1,114], index: 19, kind: input, shape index: {}]   ;;  %s3111_s20 = inlined_call_operand.hbm [shape: f32[1,32], index: 20, kind: output, shape index: {}]  }
   0x1   :  { %3114 = sst [smem:[#allocation19_spill]] %s3091_s0 }
   0x2   :  { %3115 = sst [smem:[#allocation20_spill]] %s3092_s1 }
   0x3   :  { %3116 = sst [smem:[#allocation21_spill]] %s3093_s2 }
   0x4   :  { %3117 = sst [smem:[#allocation22_spill]] %s3094_s3 }
   0x5   :  { %3118 = sst [smem:[#allocation23_spill]] %s3095_s4 }
   0x6   :  { %25 = vsyncpa [#allocation3], 0 }
   0x7   :  { %26 = vsyncpa [#allocation6], 0 }
   0x8   :  { %27 = vsyncpa [#allocation9], 0 }
   0x9   :  { %28 = vsyncpa [#allocation12], 0 }
   0xa   :  { %29 = vsyncpa [#allocation4], 0  ;;  %s2569_s1 = smov [#allocation5]  }
   0xb   :  { %s51_s22 = sshll.u32 %s2569_s1, 4  ;;  %s52_s22 = int_to_ptr.vmem [resolvable:$true] %s51_s22 }
   0xc   :  { %s2427_s23 = scalar_lea.vmem %s52_s22, 256  ;;  %p2432_p1 = scmp.lt.s32.totalorder %s52_s22, %s52_s22 }
   0xd   :  { %p2428_p0 = scmp.ne.s32.totalorder %s52_s22, %s2427_s23  ;;  %p2433_p2 = scmp.lt.s32.totalorder %s2427_s23, %s2427_s23 }
   0xf   :  { %p2434_p3 = por %p2433_p2, %p2432_p1 }
  0x11   :  { %p2435_p4 = pnand %p2434_p3, %p2428_p0 }
  0x13   :  { %2438 = shalt.err (!%p2435_p4)
}
  0x14   :  { %s2570_s24 = smov 128   ;;  %s2571_s2 = smov 8  }
  0x15   :  { %s3119_s26 = sld [smem:[#allocation23_spill]]  ;;  %s2572_s27 = smov [#allocation8]  }
  0x16   :  { %s87_s28 = sshll.u32 %s2572_s27, 4  ;;  %s2573_s4 = smov [#allocation2]   ;;  %s88_s28 = int_to_ptr.vmem [resolvable:$true] %s87_s28 }
  0x17   :  { %s42_s29 = sshll.u32 %s2573_s4, 4  ;;  %s2447_s30 = scalar_lea.vmem %s88_s28, 1024  ;;  %s43_s29 = int_to_ptr.vmem [resolvable:$true] %s42_s29 }
  0x18   :  { %p2448_p5 = scmp.ne.s32.totalorder %s88_s28, %s2447_s30  ;;  %p2452_p6 = scmp.lt.s32.totalorder %s88_s28, %s88_s28 }
  0x19   :  { %p2453_p7 = scmp.lt.s32.totalorder %s2447_s30, %s2447_s30 }
  0x1b   :  { %57 = dma.hbm_to_vmem [thread:$0]  %s3119_s26, 256, %s52_s22, [#allocation6], %s2570_s24, %s2570_s24, %s2571_s2  }
  0x1c   :  { %p2454_p8 = por %p2453_p7, %p2452_p6 }
  0x1e   :  { %p2455_p9 = pnand %p2454_p8, %p2448_p5 }
  0x20   :  { %2458 = shalt.err (!%p2455_p9)
}
  0x21   :  { %93 = dma.hbm_to_vmem [thread:$0]  %s3103_s12, 1024, %s88_s28, [#allocation9], %s2570_s24, %s2570_s24, %s2571_s2  }
  0x22   :  { %s2467_s1 = scalar_lea.vmem %s43_s29, 128  ;;  %p2472_p11 = scmp.lt.s32.totalorder %s43_s29, %s43_s29 }
  0x23   :  { %p2468_p10 = scmp.ne.s32.totalorder %s43_s29, %s2467_s1  ;;  %p2473_p12 = scmp.lt.s32.totalorder %s2467_s1, %s2467_s1 }
  0x25   :  { %p2474_p13 = por %p2473_p12, %p2472_p11 }
  0x27   :  { %p2475_p0 = pnand %p2474_p13, %p2468_p10 }
  0x29   :  { %2478 = shalt.err (!%p2475_p0)
}
  0x2a   :  { %s3120_s25 = sld [smem:[#allocation22_spill]]  ;;  %s2574_s3 = smov [#allocation7]  }
  0x2b   :  { %s67_s26 = sshll.u32 %s2574_s3, 4  ;;  %s2575_s27 = smov [#allocation10]   ;;  %s68_s26 = int_to_ptr.vmem [resolvable:$true] %s67_s26 }
  0x2c   :  { %s101_s4 = sshll.u32 %s2575_s27, 4  ;;  %s2487_s30 = scalar_lea.vmem %s68_s26, 512  ;;  %s102_s4 = int_to_ptr.vmem [resolvable:$true] %s101_s4 }
  0x2d   :  { %p2488_p1 = scmp.ne.s32.totalorder %s68_s26, %s2487_s30  ;;  %p2492_p2 = scmp.lt.s32.totalorder %s68_s26, %s68_s26 }
  0x2e   :  { %p2493_p3 = scmp.lt.s32.totalorder %s2487_s30, %s2487_s30 }
  0x30   :  { %45 = dma.hbm_to_vmem [thread:$0]  %s3120_s25, 128, %s43_s29, [#allocation3]  }
  0x31   :  { %p2494_p4 = por %p2493_p3, %p2492_p2 }
  0x33   :  { %p2495_p5 = pnand %p2494_p4, %p2488_p1 }
  0x35   :  { %2498 = shalt.err (!%p2495_p5)
}
  0x36   :  { %73 = dma.hbm_to_vmem [thread:$0]  %s3098_s7, 512, %s68_s26, [#allocation6], %s2570_s24, %s2570_s24, %s2571_s2  }
  0x37   :  { %s2507_s29 = scalar_lea.vmem %s102_s4, 512  ;;  %p2512_p7 = scmp.lt.s32.totalorder %s102_s4, %s102_s4 }
  0x38   :  { %p2508_p6 = scmp.ne.s32.totalorder %s102_s4, %s2507_s29  ;;  %p2513_p8 = scmp.lt.s32.totalorder %s2507_s29, %s2507_s29 }
  0x3a   :  { %p2514_p9 = por %p2513_p8, %p2512_p7 }
  0x3c   :  { %p2515_p10 = pnand %p2514_p9, %p2508_p6 }
  0x3e   :  { %2518 = shalt.err (!%p2515_p10)
}
  0x3f   :  { %107 = dma.hbm_to_vmem [thread:$0]  %s3105_s14, 512, %s102_s4, [#allocation9], %s2570_s24, %s2570_s24, %s2571_s2  }
  0x40   :  { %s2576_s1 = smov [#allocation11]  }
  0x41   :  { %s114_s22 = sshll.u32 %s2576_s1, 4  ;;  %s115_s22 = int_to_ptr.vmem [resolvable:$true] %s114_s22 }
  0x42   :  { %s2527_s23 = scalar_lea.vmem %s115_s22, 16  ;;  %s2531_s7 = scalar_lea.vmem %s115_s22, 32 }
  0x43   :  { %p2528_p11 = scmp.ne.s32.totalorder %s115_s22, %s2527_s23  ;;  %p2532_p12 = scmp.lt.s32.totalorder %s115_s22, %s115_s22 }
  0x44   :  { %p2533_p13 = scmp.lt.s32.totalorder %s2531_s7, %s2527_s23 }
  0x46   :  { %p2534_p0 = por %p2533_p13, %p2532_p12 }
  0x48   :  { %p2535_p1 = pnand %p2534_p0, %p2528_p11 }
  0x4a   :  { %2538 = shalt.err (!%p2535_p1)
}
  0x4b   :  { %117 = dma.hbm_to_vmem [thread:$0]  %s3106_s15, 16, %s115_s22, [#allocation12]  }
  0x4c   :  { %2559 = dma.done.wait [#allocation3], 128  }
  0x4d   :  { %2560 = vsyncadd [#allocation3], 4294967168 }
  0x4e   :  { %2561 = dma.done.wait [#allocation6], 768  }
  0x4f   :  { %2562 = vsyncadd [#allocation6], 4294966528 }
  0x50   :  { %2563 = dma.done.wait [#allocation9], 1536  }
  0x51   :  { %2564 = vsyncadd [#allocation9], 4294965760 }
  0x52   :  { %2565 = dma.done.wait [#allocation12], 16  }
  0x53   :  { %2566 = vsyncadd [#allocation12], 4294967280  ;;  %v2577_v0 = vmov 0.0   ;;  %vm2578_vm0 = vmmov 0   ;;  %v2579_v1 = vmov 0   ;;  %v268_v2 = vld [vmem:[%s3097_s6 + $0x18] sm:$0xff]  ;;  %v144_v15 = vlaneseq }
  0x54   :  { %2176 = vmatprep.subr.mxu1 %v2577_v0  ;;  %2165 = vmatprep.subr.mxu0 %v2577_v0  ;;  %v190_v3 = vld [vmem:[%s3096_s5 + $0x18] sm:$0xff]  ;;  %v267_v4 = vld [vmem:[%s3097_s6 + $0x10] sm:$0xff]  ;;  %v266_v6 = vld [vmem:[%s3097_s6 + $0x8] sm:$0xff]  ;;  %vm191_vm1 = vcmask 261120   ;;  %s3121_s3 = sld [smem:[#allocation21_spill]]  ;;  %vm339_vm2 = vcmask 64512  }
  0x55   :  { %2184 = vmatprep.mubr.msk.f32.mxu1 %vm2578_vm0, %v2577_v0  ;;  %2173 = vmatprep.mubr.msk.f32.mxu0 %vm2578_vm0, %v2577_v0  ;;  %v189_v5 = vld [vmem:[%s3096_s5 + $0x10] sm:$0xff]  ;;  %v188_v7 = vld [vmem:[%s3096_s5 + $0x8] sm:$0xff]  ;;  %v265_v8 = vld [vmem:[%s3097_s6] sm:$0xff]  ;;  %s3122_s24 = sld [smem:[#allocation20_spill]]  ;;  %v145_v16 = vand.u32 127, %v144_v15  ;;  %vm504_vm7 = vcmask 130048  }
  0x56   :  { %2397 = vset.pattern.permute.xlu0 %v2579_v1  ;;  %2398 = vset.pattern.permute.xlu1 %v2579_v1  ;;  %v187_v9 = vld [vmem:[%s3096_s5] sm:$0xff]  ;;  %v2789_v29 = vld [vmem:[#allocation5] sm:$0xff]  ;;  %v502_v31 = vld [vmem:[#allocation7] sm:$0xff]  ;;  %v147_v56 = vshrl.u32 %v144_v15, 7  ;;  %s3123_s12 = sld [smem:[#allocation19_spill]]  ;;  %s2580_s1 = smov 64  }
  0x57   :  { %2177 = vmatpush3.msra.mxu1 %v268_v2  ;;  %2166 = vmatpush3.msra.mxu0 %v190_v3  ;;  %v2753_v10 = vld [vmem:[#allocation2] sm:$0xff]  ;;  %v2798_v32 = vld [vmem:[#allocation5 + $0x8] sm:$0xff]  ;;  %v602_v33 = vld [vmem:[%s3100_s9 + $0x18] sm:$0xff]  ;;  %s2581_s22 = smov 32   ;;  %vm1825_vm9 = vcmask 1041408   ;;  %vm1821_vm10 = vcmask 932864  }
  0x58   :  { %2178 = vmatprep.subr.mxu1 %v2577_v0  ;;  %2167 = vmatprep.subr.mxu0 %v2577_v0  ;;  %v503_v28 = vld [vmem:[#allocation7 + $0x8] sm:$0xff]  ;;  %v601_v34 = vld [vmem:[%s3100_s9 + $0x10] sm:$0xff]  ;;  %v600_v35 = vld [vmem:[%s3100_s9 + $0x8] sm:$0xff]  ;;  %vm1791_vm11 = vcmask 392192   ;;  %vm1974_vm12 = vcmask 253952  }
  0x59   :  { %2179 = vmatpush3.msra.mxu1 %v267_v4  ;;  %2168 = vmatpush3.msra.mxu0 %v189_v5  ;;  %v599_v36 = vld [vmem:[%s3100_s9] sm:$0xff]  ;;  %v767_v52 = vld [vmem:[%s3102_s11 + $0x18] sm:$0xff]  ;;  %v766_v53 = vld [vmem:[%s3102_s11 + $0x10] sm:$0xff] }
  0x5a   :  { %2180 = vmatprep.subr.mxu1 %v2577_v0  ;;  %2169 = vmatprep.subr.mxu0 %v2577_v0  ;;  %v162_v11 = vld [vmem:[%s3121_s3] sm:$0xff]  ;;  %v163_v13 = vld [vmem:[%s3121_s3 + $0x8] sm:$0xff]  ;;  %v771_v1 = vld [vmem:[#allocation8 + $0x18] sm:$0xff] }
  0x5b   :  { %2181 = vmatpush3.msra.mxu1 %v266_v6  ;;  %2170 = vmatpush3.msra.mxu0 %v188_v7  ;;  %v148_v12 = vld [vmem:[%s3122_s24] sm:$0xff]  ;;  %v149_v14 = vld [vmem:[%s3122_s24 + $0x8] sm:$0xff]  ;;  %v768_v4 = vld [vmem:[#allocation8] sm:$0xff] }
  0x5c   :  { %2182 = vmatprep.subr.mxu1 %v2577_v0  ;;  %2171 = vmatprep.subr.mxu0 %v2577_v0  ;;  %v2008_v45 = vld [vmem:[%s3099_s8] ss:$0 sm:$0xff]  ;;  %v765_v54 = vld [vmem:[%s3102_s11 + $0x8] sm:$0xff] }
  0x5d   :  { %2183 = vmatpush3.msra.mxu1 %v265_v8  ;;  %2172 = vmatpush3.msra.mxu0 %v187_v9  ;;  %v764_v55 = vld [vmem:[%s3102_s11] sm:$0xff]  ;;  %v770_v2 = vld [vmem:[#allocation8 + $0x10] sm:$0xff] }
  0x5e   :  { %2185 = vmatmul.mubr.msk.f32.vlgmr.msra.gmra.mxu1 %vm191_vm1, %v2753_v10  ;;  %2174 = vmatmul.mubr.msk.f32.vlgmr.msra.gmra.mxu0 %vm191_vm1, %v2753_v10  ;;  %v1998_v57 = vld [vmem:[%s3123_s12] ss:$0 sm:$0xff] }
  0x5f   :  { %165 = vperm.xlu0 %2397, %v162_v11   ;;  %151 = vperm.xlu1 %2398, %v148_v12   ;;  %v2009_v58 = vld [vmem:[%s3101_s10] ss:$0 sm:$0xff]  ;;  %vm181_vm8 = vcmp.eq.s32.totalorder %v147_v56, %v1998_v57 }
  0x60   :  { %2204 = vmatprep.subr.mxu1 %v602_v33  ;;  %v2853_v63 = vsel %vm181_vm8, 1.0, %v2577_v0  ;;  %v769_v3 = vld [vmem:[#allocation8 + $0x8] sm:$0xff] }
  0x61   :  { %2205 = vmatpush3.msra.mxu1 %v602_v33  ;;  %v2024_v33 = vld [vmem:[%s3097_s6 + $0x30] sm:$0xff] }
  0x62   :  { %2206 = vmatprep.subr.mxu1 %v601_v34 }
  0x63   :  { %168 = vperm.xlu0 %2397, %v163_v13   ;;  %154 = vperm.xlu1 %2398, %v149_v14  }
  0x64   :  { %2207 = vmatpush3.msra.mxu1 %v601_v34  ;;  %v2018_v34 = vld [vmem:[%s3096_s5 + $0x28] sm:$0xff] }
  0x65   :  { %2208 = vmatprep.subr.mxu1 %v600_v35 }
  0x66   :  { %2209 = vmatpush3.msra.mxu1 %v600_v35  ;;  %v2023_v35 = vld [vmem:[%s3097_s6 + $0x28] sm:$0xff] }
  0x67   :  { %2210 = vmatprep.subr.mxu1 %v599_v36 }
  0x68   :  { %2211 = vmatpush3.msra.mxu1 %v599_v36  ;;  %v2017_v36 = vld [vmem:[%s3096_s5 + $0x20] sm:$0xff] }
  0x69   :  { %2233 = vmatprep.subr.mxu1 %v2577_v0 }
  0xda   :  { %v166_v17 = vpop.permute.xlu0 %165  ;;  %v152_v19 = vpop.permute.xlu1 %151 }
  0xdb   :  { %vm170_vm3 = vcmp.eq.s32.totalorder %v145_v16, %v166_v17  ;;  %vm156_vm4 = vcmp.eq.s32.totalorder %v145_v16, %v152_v19 }
  0xdc   :  { %v2775_v18 = vsel %vm170_vm3, 1.0, %v2577_v0  ;;  %v2780_v24 = vsel %vm156_vm4, 1.0, %v2577_v0 }
  0xdd   :  { %2189 = vmatprep.mubr.msk.f32.mxu0 %vm339_vm2, %v2775_v18 }
  0xde   :  { %v169_v20 = vpop.permute.xlu0 %168  ;;  %v155_v21 = vpop.permute.xlu1 %154 }
  0xdf   :  { %vm171_vm5 = vcmp.eq.s32.totalorder %v145_v16, %v169_v20  ;;  %vm157_vm6 = vcmp.eq.s32.totalorder %v145_v16, %v155_v21 }
  0xe0   :  { %v2783_v25 = vsel %vm171_vm5, 1.0, %v2577_v0  ;;  %v2792_v30 = vsel %vm157_vm6, 1.0, %v2577_v0 }
 0x11e   :  { %v335_v22 = vpop.f32.mrf.mxu1  ;;  %v261_v23 = vpop.f32.mrf.mxu0 }
 0x11f   :  { %2187 = vmatprep.subr.mxu0 %v335_v22 }
 0x120   :  { %v2186_v26 = vpop.f32.mrf.mxu1  ;;  %2188 = vmatpush3.msra.mxu0 %v335_v22  ;;  %v2175_v27 = vpop.f32.mrf.mxu0 }
 0x121   :  { %2190 = vmatmul.mubr.msk.f32.vlgmr.msra.gmra.mxu0 %vm339_vm2, %v2783_v25  ;;  %2192 = vmatprep.subr.mxu0 %v261_v23  ;;  %v2020_v27 = vld [vmem:[%s3096_s5 + $0x38] sm:$0xff] }
 0x122   :  { %2194 = vmatprep.mubr.msk.f32.mxu0 %vm339_vm2, %v2780_v24  ;;  %2193 = vmatpush3.msra.mxu0 %v261_v23 }
 0x123   :  { %2197 = vmatprep.subr.mxu0 %v503_v28 }
 0x125   :  { %2195 = vmatmul.mubr.msk.f32.vlgmr.msra.gmra.mxu0 %vm339_vm2, %v2792_v30 }
 0x126   :  { %2198 = vmatpush3.msra.mxu0 %v503_v28  ;;  %2201 = vmatprep.mubr.msk.f32.mxu0 %vm504_vm7, %v2789_v29  ;;  %v2025_v28 = vld [vmem:[%s3097_s6 + $0x38] sm:$0xff] }
 0x127   :  { %2199 = vmatprep.subr.mxu0 %v502_v31 }
 0x128   :  { %2200 = vmatpush3.msra.mxu0 %v502_v31  ;;  %v2019_v31 = vld [vmem:[%s3096_s5 + $0x30] sm:$0xff] }
 0x129   :  { %2202 = vmatmul.mubr.msk.f32.vlgmr.msra.gmra.mxu0 %vm504_vm7, %v2798_v32  ;;  %2215 = vmatprep.subr.mxu0 %v2577_v0 }
 0x12a   :  { %2219 = vmatprep.mubr.msk.f32.mxu0 %vm2578_vm0, %v2577_v0 }
 0x1e1   :  { %v2191_v37 = vpop.f32.mrf.mxu0 }
 0x1e3   :  { %v412_v38 = vpop.f32.mrf.mxu0 }
 0x1e5   :  { %v2196_v39 = vpop.f32.mrf.mxu0 }
 0x1e6   :  { %v499_v41 = vadd.f32 %v2196_v39, %v2191_v37  ;;  %v2022_v37 = vld [vmem:[%s3097_s6 + $0x20] sm:$0xff] }
 0x1e7   :  { %v493_v40 = vpop.f32.mrf.mxu0 }
 0x1e8   :  { %v494_v43 = vadd.f32 %v493_v40, %v412_v38 }
 0x1e9   :  { %v2203_v42 = vpop.f32.mrf.mxu0 }
 0x1ea   :  { %v587_v44 = vadd.f32 %v2203_v42, %v499_v41 }
 0x1eb   :  { %v577_v46 = vpop.f32.mrf.mxu0 }
 0x1ec   :  { %v586_v47 = vadd.f32 %v577_v46, %v494_v43  ;;  %v596_v48 = vadd.f32 %v2008_v45, %v587_v44  ;;  %v1254_v44 = vld [vmem:[#allocation7 + $0x18] sm:$0xff] }
 0x1ee   :  { %v595_v49 = vadd.f32 %v2008_v45, %v586_v47  ;;  %v598_v51 = vmax.f32 %v596_v48, 0.0  ;;  %v1253_v47 = vld [vmem:[#allocation7 + $0x10] sm:$0xff] }
 0x1f0   :  { %v597_v50 = vmax.f32 %v595_v49, 0.0 }
 0x1f2   :  { %2212 = vmatprep.mubr.msk.f32.mxu1 %vm191_vm1, %v597_v50 }
 0x1f3   :  { %2213 = vmatmul.mubr.msk.f32.vlgmr.msra.gmra.mxu1 %vm191_vm1, %v598_v51 }
 0x1f4   :  { %2241 = vmatprep.mubr.msk.f32.mxu1 %vm2578_vm0, %v2577_v0  ;;  %2234 = vmatpush3.msra.mxu1 %v767_v52 }
 0x1f5   :  { %2235 = vmatprep.subr.mxu1 %v2577_v0 }
 0x1f6   :  { %2236 = vmatpush3.msra.mxu1 %v766_v53 }
 0x1f7   :  { %2237 = vmatprep.subr.mxu1 %v2577_v0 }
 0x1f8   :  { %2238 = vmatpush3.msra.mxu1 %v765_v54  ;;  %v2034_v54 = vld [vmem:[%s3099_s8 + $0x1] ss:$0 sm:$0xff] }
 0x1f9   :  { %2239 = vmatprep.subr.mxu1 %v2577_v0 }
 0x1fa   :  { %2240 = vmatpush3.msra.mxu1 %v764_v55 }
 0x1fb   :  { %2242 = vmatmul.mubr.msk.f32.vlgmr.msra.gmra.mxu1 %vm191_vm1, %v2753_v10  ;;  %2255 = vmatprep.subr.mxu1 %v2577_v0  ;;  %v2015_v10 = vld [vmem:[%s3104_s13] ss:$0 sm:$0xff] }
 0x1fc   :  { %2263 = vmatprep.mubr.msk.f32.mxu1 %vm2578_vm0, %v2577_v0  ;;  %2256 = vmatpush3.msra.mxu1 %v2025_v28 }
 0x1fd   :  { %2257 = vmatprep.subr.mxu1 %v2577_v0 }
 0x1fe   :  { %2258 = vmatpush3.msra.mxu1 %v2024_v33 }
 0x1ff   :  { %2259 = vmatprep.subr.mxu1 %v2577_v0 }
 0x200   :  { %2260 = vmatpush3.msra.mxu1 %v2023_v35 }
 0x201   :  { %2261 = vmatprep.subr.mxu1 %v2577_v0 }
 0x202   :  { %2262 = vmatpush3.msra.mxu1 %v2022_v37  ;;  %v1697_v37 = vld [vmem:[#allocation10 + $0x18] sm:$0xff] }
 0x2b3   :  { %v2214_v59 = vpop.f32.mrf.mxu1 }
 0x2b4   :  { %v688_v60 = vadd.f32 %v2214_v59, %v2009_v58 }
 0x2b5   :  { %v682_v61 = vpop.f32.mrf.mxu1 }
 0x2b6   :  { %v683_v62 = vadd.f32 %v2009_v58, %v682_v61  ;;  %2216 = vmatpush3.msra.mxu0 %v688_v60  ;;  %v2047_v61 = vld [vmem:[%s3102_s11 + $0x38] sm:$0xff] }
 0x2b7   :  { %2217 = vmatprep.subr.mxu0 %v2577_v0 }
 0x2b8   :  { %2218 = vmatpush3.msra.mxu0 %v683_v62  ;;  %v2046_v62 = vld [vmem:[%s3102_s11 + $0x30] sm:$0xff] }
 0x2b9   :  { %2220 = vmatmul.mubr.msk.f32.vlgmr.msra.gmra.mxu0 %vm504_vm7, %v2853_v63  ;;  %2222 = vmatprep.subr.mxu0 %v2577_v0 }
 0x2ba   :  { %2223 = vmatpush3.msra.mxu0 %v771_v1  ;;  %2230 = vmatprep.mubr.msk.f32.mxu0 %vm2578_vm0, %v2577_v0  ;;  %v2045_v1 = vld [vmem:[%s3102_s11 + $0x28] sm:$0xff] }
 0x2bb   :  { %2224 = vmatprep.subr.mxu0 %v2577_v0  ;;  %v911_v5 = vpop.f32.mrf.mxu1 }
 0x2bc   :  { %2225 = vmatpush3.msra.mxu0 %v770_v2  ;;  %v2044_v2 = vld [vmem:[%s3102_s11 + $0x20] sm:$0xff] }
 0x2bd   :  { %2226 = vmatprep.subr.mxu0 %v2577_v0  ;;  %v2243_v6 = vpop.f32.mrf.mxu1 }
 0x2be   :  { %2227 = vmatpush3.msra.mxu0 %v769_v3  ;;  %v2040_v3 = vld [vmem:[%s3101_s10 + $0x1] ss:$0 sm:$0xff] }
 0x2bf   :  { %2228 = vmatprep.subr.mxu0 %v2577_v0 }
 0x2c0   :  { %2229 = vmatpush3.msra.mxu0 %v768_v4 }
 0x2c1   :  { %2244 = vmatprep.subr.mxu0 %v2577_v0 }
 0x379   :  { %v760_v7 = vpop.f32.mrf.mxu0 }
 0x37a   :  { %2231 = vmatmul.mubr.msk.f32.vlgmr.msra.gmra.mxu0 %vm191_vm1, %v760_v7 }
 0x37b   :  { %v2221_v8 = vpop.f32.mrf.mxu0  ;;  %2252 = vmatprep.mubr.msk.f32.mxu0 %vm2578_vm0, %v2577_v0  ;;  %2245 = vmatpush3.msra.mxu0 %v2020_v27 }
 0x37c   :  { %2246 = vmatprep.subr.mxu0 %v2577_v0  ;;  %v1517_v8 = vld [vmem:[#allocation8 + $0x38] sm:$0xff] }
 0x37d   :  { %2247 = vmatpush3.msra.mxu0 %v2019_v31 }
 0x37e   :  { %2248 = vmatprep.subr.mxu0 %v2577_v0 }
 0x37f   :  { %2249 = vmatpush3.msra.mxu0 %v2018_v34 }
 0x380   :  { %2250 = vmatprep.subr.mxu0 %v2577_v0 }
 0x381   :  { %2251 = vmatpush3.msra.mxu0 %v2017_v36 }
 0x43a   :  { %v841_v9 = vpop.f32.mrf.mxu0 }
 0x43b   :  { %v912_v11 = vadd.f32 %v911_v5, %v841_v9  ;;  %v1516_v9 = vld [vmem:[#allocation8 + $0x30] sm:$0xff] }
 0x43c   :  { %v2232_v12 = vpop.f32.mrf.mxu0 }
 0x43d   :  { %v922_v13 = vadd.f32 %v2015_v10, %v912_v11  ;;  %v1515_v11 = vld [vmem:[#allocation8 + $0x28] sm:$0xff] }
 0x43f   :  { %2399 = vtanh.f32 %v922_v13  ;;  %v2016_v15 = vmul.f32 -1.442695, %v922_v13  ;;  %v1514_v13 = vld [vmem:[#allocation8 + $0x20] sm:$0xff] }
 0x441   :  { %2401 = vpow2.f32 %v2016_v15 }
 0x44c   :  { %v2400_v14 = vpop.eup %2399 }
 0x44d   :  { %932 = vrot.lane.b32.xlu0 %v2400_v14, %s2580_s1 }
 0x44e   :  { %v2402_v16 = vpop.eup %2401 }
 0x44f   :  { %v926_v17 = vadd.f32 1.0, %v2402_v16  ;;  %v2051_v16 = vld [vmem:[%s3104_s13 + $0x1] ss:$0 sm:$0xff] }
 0x451   :  { %2403 = vrcp.f32 %v926_v17 }
 0x45e   :  { %v2404_v19 = vpop.eup %2403 }
 0x45f   :  { %v930_v22 = vmul.f32 0.0, %v2404_v19 }
 0x4bf   :  { %v933_v20 = vpop.permute.xlu0 %932 }
 0x4c0   :  { %v935_v21 = vmul.f32 %v2404_v19, %v933_v20 }
 0x4c2   :  { %937 = vrot.lane.b32.xlu1 %v935_v21, %s2581_s22 }
 0x534   :  { %v938_v23 = vpop.permute.xlu1 %937 }
 0x535   :  { %v2873_v26 = vadd.f32 %v938_v23, %v930_v22 }
 0x537   :  { %2405 = vtanh.f32 %v2873_v26 }
 0x544   :  { %v2406_v38 = vpop.eup %2405 }
 0x545   :  { %943 = vrot.lane.b32.xlu0 %v2406_v38, %s2580_s1  ;;  %v1696_v38 = vld [vmem:[#allocation10 + $0x10] sm:$0xff] }
 0x5b7   :  { %v944_v39 = vpop.permute.xlu0 %943 }
 0x5b8   :  { %v946_v40 = vmul.f32 %v2404_v19, %v944_v39  ;;  %v1695_v39 = vld [vmem:[#allocation10 + $0x8] sm:$0xff] }
 0x5ba   :  { %953 = vrot.lane.b32.xlu1 %v946_v40, %s2581_s22  ;;  %v1694_v40 = vld [vmem:[#allocation10] sm:$0xff] }
 0x62c   :  { %v2908_v41 = vpop.permute.xlu1 %953 }
 0x62d   :  { %2253 = vmatmul.mubr.msk.f32.vlgmr.msra.gmra.mxu0 %vm191_vm1, %v2908_v41  ;;  %2264 = vmatmul.mubr.msk.f32.vlgmr.msra.gmra.mxu1 %vm191_vm1, %v2908_v41 }
 0x62e   :  { %2268 = vmatprep.mubr.msk.f32.mxu0 %vm339_vm2, %v2775_v18  ;;  %2273 = vmatprep.mubr.msk.f32.mxu1 %vm339_vm2, %v2780_v24  ;;  %v2038_v18 = vld [vmem:[%s3100_s9 + $0x38] sm:$0xff]  ;;  %v2037_v24 = vld [vmem:[%s3100_s9 + $0x30] sm:$0xff] }
 0x6ed   :  { %v1023_v42 = vpop.f32.mrf.mxu0  ;;  %v1098_v43 = vpop.f32.mrf.mxu1 }
 0x6ee   :  { %2266 = vmatprep.subr.mxu0 %v1098_v43  ;;  %2271 = vmatprep.subr.mxu1 %v1023_v42 }
 0x6ef   :  { %v2254_v45 = vpop.f32.mrf.mxu0  ;;  %v2265_v46 = vpop.f32.mrf.mxu1  ;;  %2267 = vmatpush3.msra.mxu0 %v1098_v43  ;;  %2272 = vmatpush3.msra.mxu1 %v1023_v42 }
 0x6f0   :  { %2269 = vmatmul.mubr.msk.f32.vlgmr.msra.gmra.mxu0 %vm339_vm2, %v2783_v25  ;;  %2274 = vmatmul.mubr.msk.f32.vlgmr.msra.gmra.mxu1 %vm339_vm2, %v2792_v30  ;;  %v2036_v25 = vld [vmem:[%s3100_s9 + $0x28] sm:$0xff]  ;;  %v1818_v46 = vld [vmem:[%s3108_s17 + $0x60] sm:$0xff] }
 0x6f1   :  { %2276 = vmatprep.subr.mxu0 %v1254_v44  ;;  %2280 = vmatprep.mubr.msk.f32.mxu0 %vm504_vm7, %v2789_v29  ;;  %v2035_v29 = vld [vmem:[%s3100_s9 + $0x20] sm:$0xff]  ;;  %v1819_v45 = vld [vmem:[%s3108_s17 + $0x68] sm:$0xff]  ;;  %s2582_s9 = smov 80  }
 0x6f2   :  { %2277 = vmatpush3.msra.mxu0 %v1254_v44  ;;  %2283 = vmatprep.subr.mxu1 %v2038_v18  ;;  %v1820_v44 = vld [vmem:[%s3108_s17 + $0x70] sm:$0x3] }
 0x6f3   :  { %2278 = vmatprep.subr.mxu0 %v1253_v47  ;;  %2284 = vmatpush3.msra.mxu1 %v2038_v18  ;;  %v1816_v18 = vld [vmem:[%s3108_s17 + $0x50] sm:$0xff] }
 0x6f4   :  { %2279 = vmatpush3.msra.mxu0 %v1253_v47  ;;  %2285 = vmatprep.subr.mxu1 %v2037_v24  ;;  %v1817_v47 = vld [vmem:[%s3108_s17 + $0x58] sm:$0xff] }
 0x6f5   :  { %2281 = vmatmul.mubr.msk.f32.vlgmr.msra.gmra.mxu0 %vm504_vm7, %v2798_v32  ;;  %2294 = vmatprep.subr.mxu0 %v2577_v0 }
 0x6f6   :  { %2298 = vmatprep.mubr.msk.f32.mxu0 %vm2578_vm0, %v2577_v0  ;;  %2286 = vmatpush3.msra.mxu1 %v2037_v24  ;;  %v1815_v24 = vld [vmem:[%s3108_s17 + $0x48] sm:$0xff] }
 0x6f7   :  { %2287 = vmatprep.subr.mxu1 %v2036_v25 }
 0x6f8   :  { %2288 = vmatpush3.msra.mxu1 %v2036_v25  ;;  %v1814_v25 = vld [vmem:[%s3108_s17 + $0x40] sm:$0xff] }
 0x6f9   :  { %2289 = vmatprep.subr.mxu1 %v2035_v29 }
 0x6fa   :  { %2290 = vmatpush3.msra.mxu1 %v2035_v29  ;;  %v1813_v29 = vld [vmem:[%s3108_s17 + $0x38] sm:$0xff] }
 0x6fb   :  { %2312 = vmatprep.subr.mxu1 %v2577_v0 }
 0x7b0   :  { %v2270_v30 = vpop.f32.mrf.mxu0  ;;  %v2275_v32 = vpop.f32.mrf.mxu1 }
 0x7b1   :  { %v1249_v50 = vadd.f32 %v2275_v32, %v2270_v30  ;;  %v1812_v30 = vld [vmem:[%s3108_s17 + $0x30] sm:$0xff]  ;;  %v1811_v32 = vld [vmem:[%s3108_s17 + $0x28] sm:$0xff] }
 0x7b2   :  { %v1168_v48 = vpop.f32.mrf.mxu0  ;;  %v1243_v49 = vpop.f32.mrf.mxu1 }
 0x7b3   :  { %v1244_v52 = vadd.f32 %v1243_v49, %v1168_v48  ;;  %v1804_v48 = vld [vmem:[%s3107_s16 + $0x28] sm:$0xff]  ;;  %v1810_v49 = vld [vmem:[%s3108_s17 + $0x20] sm:$0xff] }
 0x7b5   :  { %v2282_v51 = vpop.f32.mrf.mxu0 }
 0x7b6   :  { %v1331_v53 = vadd.f32 %v2282_v51, %v1249_v50  ;;  %v1803_v50 = vld [vmem:[%s3107_s16 + $0x20] sm:$0xff]  ;;  %v1809_v51 = vld [vmem:[%s3108_s17 + $0x18] sm:$0xff] }
 0x7b7   :  { %v1321_v55 = vpop.f32.mrf.mxu0 }
 0x7b8   :  { %v1330_v56 = vadd.f32 %v1321_v55, %v1244_v52  ;;  %v1341_v57 = vadd.f32 %v2034_v54, %v1331_v53  ;;  %v2053_v52 = vld [vmem:[#allocation11] ss:$0 sm:$0xff] }
 0x7b9   :  { %v1802_v53 = vld [vmem:[%s3107_s16 + $0x18] sm:$0xff] }
 0x7ba   :  { %v1340_v58 = vadd.f32 %v2034_v54, %v1330_v56  ;;  %v1343_v60 = vmax.f32 %v1341_v57, 0.0  ;;  %v1808_v54 = vld [vmem:[%s3108_s17 + $0x10] sm:$0xff]  ;;  %v1807_v57 = vld [vmem:[%s3108_s17 + $0x8] sm:$0xff] }
 0x7bb   :  { %v1801_v56 = vld [vmem:[%s3107_s16 + $0x10] sm:$0xff] }
 0x7bc   :  { %v1342_v59 = vmax.f32 %v1340_v58, 0.0 }
 0x7be   :  { %2291 = vmatprep.mubr.msk.f32.mxu1 %vm191_vm1, %v1342_v59 }
 0x7bf   :  { %2292 = vmatmul.mubr.msk.f32.vlgmr.msra.gmra.mxu1 %vm191_vm1, %v1343_v60  ;;  %v1800_v60 = vld [vmem:[%s3107_s16 + $0x8] sm:$0xff] }
 0x7c0   :  { %2313 = vmatpush3.msra.mxu1 %v2047_v61  ;;  %2320 = vmatprep.mubr.msk.f32.mxu1 %vm2578_vm0, %v2577_v0  ;;  %v1806_v61 = vld [vmem:[%s3108_s17] sm:$0xff] }
 0x7c1   :  { %2314 = vmatprep.subr.mxu1 %v2577_v0 }
 0x7c2   :  { %2315 = vmatpush3.msra.mxu1 %v2046_v62  ;;  %v1799_v62 = vld [vmem:[%s3107_s16] sm:$0xff] }
 0x7c3   :  { %2316 = vmatprep.subr.mxu1 %v2577_v0 }
 0x7c4   :  { %2317 = vmatpush3.msra.mxu1 %v2045_v1  ;;  %v1805_v1 = vld [vmem:[%s3110_s19] sm:$0x1]  ;;  %s2583_s19 = smov [#allocation13]  }
 0x7c5   :  { %2318 = vmatprep.subr.mxu1 %v2577_v0  ;;  %s1982_s4 = sshll.u32 %s2583_s19, 4  ;;  %s1983_s4 = int_to_ptr.vmem [resolvable:$true] %s1982_s4 }
 0x7c6   :  { %2319 = vmatpush3.msra.mxu1 %v2044_v2  ;;  %s2539_s30 = scalar_lea.vmem %s1983_s4, 16  ;;  %s2543_s12 = scalar_lea.vmem %s1983_s4, 32 }
 0x7c7   :  { %2321 = vmatmul.mubr.msk.f32.vlgmr.msra.gmra.mxu1 %vm191_vm1, %v2908_v41  ;;  %2334 = vmatprep.subr.mxu1 %v2577_v0  ;;  %p2540_p2 = scmp.ne.s32.totalorder %s1983_s4, %s2539_s30  ;;  %p2544_p3 = scmp.lt.s32.totalorder %s1983_s4, %s1983_s4 }
 0x7c8   :  { %2364 = vmatprep.mubr.msk.f32.mxu1 %vm2578_vm0, %v2577_v0  ;;  %2335 = vmatpush3.msk.msra.mxu1 %vm1825_vm9, %v1820_v44  ;;  %p2545_p4 = scmp.lt.s32.totalorder %s2543_s12, %s2539_s30 }
 0x7c9   :  { %2336 = vmatprep.subr.mxu1 %v2577_v0 }
 0x7ca   :  { %2337 = vmatpush3.msra.mxu1 %v1819_v45  ;;  %p2546_p5 = por %p2545_p4, %p2544_p3 }
 0x7cb   :  { %2338 = vmatprep.subr.mxu1 %v2577_v0 }
 0x7cc   :  { %2339 = vmatpush3.msra.mxu1 %v1818_v46  ;;  %p2547_p6 = pnand %p2546_p5, %p2540_p2 }
 0x7cd   :  { %2340 = vmatprep.subr.mxu1 %v2577_v0 }
 0x7ce   :  { %2341 = vmatpush3.msra.mxu1 %v1817_v47 }
 0x7cf   :  { %2342 = vmatprep.subr.mxu1 %v2577_v0 }
 0x7d0   :  { %2343 = vmatpush3.msra.mxu1 %v1816_v18 }
 0x7d1   :  { %2344 = vmatprep.subr.mxu1 %v2577_v0 }
 0x7d2   :  { %2345 = vmatpush3.msra.mxu1 %v1815_v24 }
 0x7d3   :  { %2346 = vmatprep.subr.mxu1 %v2577_v0 }
 0x7d4   :  { %2347 = vmatpush3.msra.mxu1 %v1814_v25 }
 0x7d5   :  { %2348 = vmatprep.subr.mxu1 %v2577_v0 }
 0x7d6   :  { %2349 = vmatpush3.msra.mxu1 %v1813_v29 }
 0x7d7   :  { %2350 = vmatprep.subr.mxu1 %v2577_v0 }
 0x7d8   :  { %2351 = vmatpush3.msra.mxu1 %v1812_v30 }
 0x7d9   :  { %2352 = vmatprep.subr.mxu1 %v2577_v0 }
 0x7da   :  { %2353 = vmatpush3.msra.mxu1 %v1811_v32 }
 0x7db   :  { %2354 = vmatprep.subr.mxu1 %v2577_v0 }
 0x7dc   :  { %2355 = vmatpush3.msra.mxu1 %v1810_v49 }
 0x7dd   :  { %2356 = vmatprep.subr.mxu1 %v2577_v0 }
 0x7de   :  { %2357 = vmatpush3.msra.mxu1 %v1809_v51 }
 0x7df   :  { %2358 = vmatprep.subr.mxu1 %v2577_v0 }
 0x7e0   :  { %2359 = vmatpush3.msra.mxu1 %v1808_v54 }
 0x7e1   :  { %2360 = vmatprep.subr.mxu1 %v2577_v0 }
 0x7e2   :  { %2361 = vmatpush3.msra.mxu1 %v1807_v57 }
 0x7e3   :  { %2362 = vmatprep.subr.mxu1 %v2577_v0 }
 0x7e4   :  { %2363 = vmatpush3.msra.mxu1 %v1806_v61 }
 0x7e5   :  { %2365 = vmatmul.mubr.msk.f32.vlgmr.msra.gmra.mxu1 %vm1821_vm10, %v1805_v1 }
 0x87f   :  { %v2293_v4 = vpop.f32.mrf.mxu1 }
 0x880   :  { %v1435_v5 = vadd.f32 %v2293_v4, %v2040_v3 }
 0x881   :  { %v1429_v6 = vpop.f32.mrf.mxu1 }
 0x882   :  { %v1430_v7 = vadd.f32 %v2040_v3, %v1429_v6  ;;  %2295 = vmatpush3.msra.mxu0 %v1435_v5 }
 0x883   :  { %2296 = vmatprep.subr.mxu0 %v2577_v0 }
 0x884   :  { %2297 = vmatpush3.msra.mxu0 %v1430_v7 }
 0x885   :  { %2299 = vmatmul.mubr.msk.f32.vlgmr.msra.gmra.mxu0 %vm504_vm7, %v2853_v63  ;;  %2301 = vmatprep.subr.mxu0 %v2577_v0 }
 0x886   :  { %2302 = vmatpush3.msra.mxu0 %v1517_v8  ;;  %2309 = vmatprep.mubr.msk.f32.mxu0 %vm2578_vm0, %v2577_v0 }
 0x887   :  { %v1657_v10 = vpop.f32.mrf.mxu1  ;;  %2303 = vmatprep.subr.mxu0 %v2577_v0 }
 0x888   :  { %2304 = vmatpush3.msra.mxu0 %v1516_v9 }
 0x889   :  { %v2322_v12 = vpop.f32.mrf.mxu1  ;;  %2305 = vmatprep.subr.mxu0 %v2577_v0 }
 0x88a   :  { %2306 = vmatpush3.msra.mxu0 %v1515_v11 }
 0x88b   :  { %2307 = vmatprep.subr.mxu0 %v2577_v0 }
 0x88c   :  { %2308 = vmatpush3.msra.mxu0 %v1514_v13 }
 0x88d   :  { %2323 = vmatprep.subr.mxu0 %v2577_v0 }
 0x945   :  { %v1504_v63 = vpop.f32.mrf.mxu0 }
 0x946   :  { %2310 = vmatmul.mubr.msk.f32.vlgmr.msra.gmra.mxu0 %vm191_vm1, %v1504_v63 }
 0x947   :  { %v2300_v14 = vpop.f32.mrf.mxu0  ;;  %2331 = vmatprep.mubr.msk.f32.mxu0 %vm2578_vm0, %v2577_v0  ;;  %2324 = vmatpush3.msra.mxu0 %v1697_v37 }
 0x948   :  { %2325 = vmatprep.subr.mxu0 %v2577_v0 }
 0x949   :  { %2326 = vmatpush3.msra.mxu0 %v1696_v38 }
 0x94a   :  { %2327 = vmatprep.subr.mxu0 %v2577_v0 }
 0x94b   :  { %2328 = vmatpush3.msra.mxu0 %v1695_v39 }
 0x94c   :  { %2329 = vmatprep.subr.mxu0 %v2577_v0 }
 0x94d   :  { %2330 = vmatpush3.msra.mxu0 %v1694_v40 }
 0x94e   :  { %2367 = vmatprep.subr.mxu0 %v2577_v0 }
 0xa06   :  { %v1587_v15 = vpop.f32.mrf.mxu0 }
 0xa07   :  { %v1658_v17 = vadd.f32 %v1657_v10, %v1587_v15 }
 0xa08   :  { %v2311_v19 = vpop.f32.mrf.mxu0 }
 0xa09   :  { %v1669_v20 = vadd.f32 %v2051_v16, %v1658_v17  ;;  %v1972_v16 = vld [vmem:[%s3109_s18] sm:$0x1] }
 0xa0b   :  { %2407 = vtanh.f32 %v1669_v20  ;;  %v2052_v22 = vmul.f32 -1.442695, %v1669_v20 }
 0xa0d   :  { %2409 = vpow2.f32 %v2052_v22 }
 0xa18   :  { %v2408_v21 = vpop.eup %2407 }
 0xa19   :  { %1679 = vrot.lane.b32.xlu0 %v2408_v21, %s2580_s1 }
 0xa1a   :  { %v2410_v23 = vpop.eup %2409 }
 0xa1b   :  { %v1673_v27 = vadd.f32 1.0, %v2410_v23 }
 0xa1d   :  { %2411 = vrcp.f32 %v1673_v27 }
 0xa2a   :  { %v2412_v28 = vpop.eup %2411 }
 0xa2b   :  { %v1677_v34 = vmul.f32 %v2412_v28, %v2873_v26 }
 0xa8b   :  { %v1680_v31 = vpop.permute.xlu0 %1679 }
 0xa8c   :  { %v1682_v33 = vmul.f32 %v2412_v28, %v1680_v31 }
 0xa8e   :  { %1684 = vrot.lane.b32.xlu1 %v1682_v33, %s2581_s22 }
 0xb00   :  { %v1685_v35 = vpop.permute.xlu1 %1684 }
 0xb01   :  { %v1687_v36 = vadd.f32 %v1685_v35, %v1677_v34 }
 0xb03   :  { %2413 = vtanh.f32 %v1687_v36 }
 0xb10   :  { %v2414_v26 = vpop.eup %2413 }
 0xb11   :  { %1690 = vrot.lane.b32.xlu0 %v2414_v26, %s2580_s1 }
 0xb83   :  { %v1691_v41 = vpop.permute.xlu0 %1690 }
 0xb84   :  { %v1693_v42 = vmul.f32 %v2412_v28, %v1691_v41 }
 0xb86   :  { %1706 = vrot.lane.b32.xlu1 %v1693_v42, %s2581_s22 }
 0xbf8   :  { %v1707_v43 = vpop.permute.xlu1 %1706 }
 0xbf9   :  { %2332 = vmatmul.mubr.msk.f32.vlgmr.msra.gmra.mxu0 %vm191_vm1, %v1707_v43 }
 0xbfa   :  { %2379 = vmatprep.mubr.msk.f32.mxu0 %vm2578_vm0, %v2577_v0  ;;  %2368 = vmatpush3.msra.mxu0 %v1804_v48 }
 0xbfb   :  { %2369 = vmatprep.subr.mxu0 %v2577_v0 }
 0xbfc   :  { %2370 = vmatpush3.msra.mxu0 %v1803_v50 }
 0xbfd   :  { %2371 = vmatprep.subr.mxu0 %v2577_v0 }
 0xbfe   :  { %2372 = vmatpush3.msra.mxu0 %v1802_v53 }
 0xbff   :  { %2373 = vmatprep.subr.mxu0 %v2577_v0 }
 0xc00   :  { %2374 = vmatpush3.msra.mxu0 %v1801_v56 }
 0xc01   :  { %2375 = vmatprep.subr.mxu0 %v2577_v0 }
 0xc02   :  { %2376 = vmatpush3.msra.mxu0 %v1800_v60 }
 0xc03   :  { %2377 = vmatprep.subr.mxu0 %v2577_v0  ;;  %v1895_v0 = vpop.f32.mrf.mxu1 }
 0xc04   :  { %2378 = vmatpush3.msra.mxu0 %v1799_v62 }
 0xc05   :  { %v2366_v14 = vpop.f32.mrf.mxu1 }
 0xcb9   :  { %v1776_v55 = vpop.f32.mrf.mxu0 }
 0xcba   :  { %v1777_v58 = vadd.f32 %v2053_v52, %v1776_v55 }
 0xcbb   :  { %v2333_v59 = vpop.f32.mrf.mxu0 }
 0xcbc   :  { %1787 = vrot.lane.b32.xlu0 %v1777_v58, %s2582_s9  ;;  %v2055_v2 = vmul.f32 -1.442695, %v1777_v58 }
 0xcbe   :  { %2415 = vpow2.f32 %v2055_v2 }
 0xccb   :  { %v2416_v3 = vpop.eup %2415 }
 0xccc   :  { %v1783_v4 = vadd.f32 1.0, %v2416_v3 }
 0xcce   :  { %2417 = vrcp.f32 %v1783_v4 }
 0xcdb   :  { %v2418_v5 = vpop.eup %2417 }
 0xd2e   :  { %v1788_v6 = vpop.permute.xlu0 %1787 }
 0xd2f   :  { %v1790_v7 = vmul.f32 %v2418_v5, %v1788_v6 }
 0xd31   :  { %v1792_v8 = vsel %vm1791_vm11, %v1790_v7, 0.0 }
 0xd32   :  { %v1793_v9 = vrot.slane %v1792_v8, 4 }
 0xd34   :  { %v1794_v10 = vadd.f32 %v1793_v9, %v1792_v8 }
 0xd36   :  { %v1795_v11 = vrot.slane %v1794_v10, 2 }
 0xd38   :  { %v1796_v12 = vadd.f32 %v1795_v11, %v1794_v10 }
 0xd3a   :  { %v1797_v13 = vrot.slane %v1796_v12, 1 }
 0xd3c   :  { %v1798_v63 = vadd.f32 %v1797_v13, %v1796_v12 }
 0xd3e   :  { %2380 = vmatmul.mubr.msk.f32.vlgmr.msra.gmra.mxu0 %vm1791_vm11, %v1798_v63 }
 0xdfe   :  { %v1968_v15 = vpop.f32.mrf.mxu0 }
 0xdff   :  { %v1969_v17 = vadd.f32 %v1968_v15, %v1895_v0 }
 0xe00   :  { %v2381_v19 = vpop.f32.mrf.mxu0 }
 0xe01   :  { %v1973_v20 = vadd.f32 %v1972_v16, %v1969_v17 }
 0xe03   :  { %1975 = vst.msk [vmem:[#allocation13] sm:$0x1] %vm1974_vm12, %v1973_v20 }
 0xe04   :  { %2550 = shalt.err (!%p2547_p6)
}
 0xe05   :  { %1985 = dma.vmem_to_hbm [thread:$0]  %s1983_s4, 16, %s3111_s20, [#allocation4]  }
 0xe06   :  { %2567 = dma.done.wait [#allocation4], 16  }
 0xe07   :  { %2568 = vsyncadd [#allocation4], 4294967280 }
 0xe08   :  { %1989 = vsyncpa [#allocation3], 1 }
 0xe09   :  { %1990 = vsyncpa [#allocation6], 1 }
 0xe0a   :  { %1991 = vsyncpa [#allocation9], 1 }
 0xe0b   :  { %1992 = vsyncpa [#allocation12], 1 }
 0xe0c   :  { %1993 = vsyncpa [#allocation4], 1 }

</bundles_post_ra>
